<compile_context>
chip_gen: v7x
topology: tpu7x:2x2x1
jax: 0.10.0
libtpu: 0.0.40
codegen_flags: <defaults>
</compile_context>

<pallas_src>
import functools

import jax
import jax.numpy as jnp
from jax.experimental import pallas as pl
from jax.experimental.pallas import tpu as pltpu

OUT_PAD = 128  # lane-dense padded output width (true logit count = 2)


def pointer_kernel(hp_ref, sp_ref, wus_ref, wvh_ref, bias_ref,
                   wout_ref, bout_ref, o_ref):
    hp = hp_ref[...]                                   # (TM, H) bf16
    sp = sp_ref[...]                                   # (TM, H) bf16

    # Both HxH projections: bf16 MXU operands, f32 accumulation, summed into a
    # single f32 accumulator before the bias add.
    acc = jnp.dot(sp, wus_ref[...], preferred_element_type=jnp.float32)
    acc = acc + jnp.dot(hp, wvh_ref[...], preferred_element_type=jnp.float32)

    # Elementwise term + folded (b_us + b_vh) bias in f32 on the VPU.
    h = acc + hp.astype(jnp.float32) * sp.astype(jnp.float32) + bias_ref[...]

    # Lane-dense bf16 final projection (Wout^T zero-padded to 128 columns).
    o = jnp.dot(h.astype(jnp.bfloat16), wout_ref[...],
                preferred_element_type=jnp.float32)
    o_ref[...] = (o + bout_ref[...]).astype(o_ref.dtype)


def prepare_pointer_params(params):
    """One-time packing of the PyTorch-layout params into kernel layout."""
    H = params["us_w"].shape[0]
    wout_t = jnp.zeros((H, OUT_PAD), jnp.bfloat16).at[:, :2].set(
        params["out_w"].astype(jnp.bfloat16).T)
    bout = jnp.zeros((1, OUT_PAD), jnp.float32).at[0, :2].set(
        params["out_b"].astype(jnp.float32))
    return {
        "us_wt": params["us_w"].astype(jnp.bfloat16).T,          # [H, H] bf16
        "vh_wt": params["vh_w"].astype(jnp.bfloat16).T,          # [H, H] bf16
        "bias": (params["us_b"] + params["vh_b"]).astype(jnp.float32).reshape(1, H),
        "out_wt": wout_t,                                        # [H, 128] bf16
        "out_b": bout,                                           # [1, 128] f32
    }


@functools.partial(jax.jit, static_argnames=("tm", "single_buffer_weights"))
def _pointer_forward_impl(hp, sp, kparams, *, tm, single_buffer_weights):
    B, S, H = hp.shape
    M = B * S

    # Tile size over the fused batch*seq axis.  For M >= 256 keep TM a multiple
    # of 128 and <= ceil(M/2) so there are >= 2 grid steps (v7x megacore); for
    # small M a single full block (block dim == array dim) is always legal.
    tm = max(128, (tm // 128) * 128)
    if M < 256:
        TM = M
    else:
        TM = min(tm, max(128, ((M // 2) // 128) * 128))
    grid = (pl.cdiv(M, TM),)

    # Cast-once to bf16 (no zero padding; partial last block reads are safe —
    # rows are independent and the invalid rows never reach the output array).
    hp2 = hp.reshape(M, H).astype(jnp.bfloat16)
    sp2 = sp.reshape(M, H).astype(jnp.bfloat16)

    # VMEM budget (bytes): double-buffered activation/output tiles + resident
    # weights (single- or double-buffered), counted once, plus fixed headroom.
    w_bufs = 1 if single_buffer_weights else 2
    vmem_needed = (
        2 * 2 * (TM * H * 2)                                   # hp + sp bf16 tiles
        + w_bufs * (2 * H * H * 2 + H * 4 + H * OUT_PAD * 2 + OUT_PAD * 4)
        + 2 * (TM * OUT_PAD * 2)                               # bf16 output tile
    )
    try:
        vmem_cap = int(pltpu.get_tpu_info().vmem_capacity_bytes)
    except Exception:
        vmem_cap = 64 * 1024 * 1024                            # conservative (v7x)
    vmem_limit = int(min(max(vmem_needed + 4 * 1024 * 1024, 32 * 1024 * 1024),
                         (3 * vmem_cap) // 4))                 # ~96 MiB v5e/v6e, ~48 MiB v7x

    def resident(shape):
        # Constant index_map -> block stays resident across the grid; request a
        # single buffer to avoid pointless double-buffering of the weights.
        if single_buffer_weights:
            return pl.BlockSpec(shape, lambda i: (0,) * len(shape),
                                pipeline_mode=pl.Buffered(1))
        return pl.BlockSpec(shape, lambda i: (0,) * len(shape))

    out = pl.pallas_call(
        pointer_kernel,
        out_shape=jax.ShapeDtypeStruct((M, OUT_PAD), jnp.bfloat16),
        grid=grid,
        in_specs=[
            pl.BlockSpec((TM, H), lambda i: (i, 0)),          # hp tile (bf16)
            pl.BlockSpec((TM, H), lambda i: (i, 0)),          # sp tile (bf16)
            resident((H, H)),                                 # Wus^T (resident)
            resident((H, H)),                                 # Wvh^T (resident)
            resident((1, H)),                                 # b_us + b_vh
            resident((H, OUT_PAD)),                           # Wout^T (padded, bf16)
            resident((1, OUT_PAD)),                           # b_out (padded)
        ],
        out_specs=pl.BlockSpec((TM, OUT_PAD), lambda i: (i, 0)),
        compiler_params=pltpu.CompilerParams(
            dimension_semantics=("parallel",),
            vmem_limit_bytes=vmem_limit,
        ),
    )(hp2, sp2, kparams["us_wt"], kparams["vh_wt"], kparams["bias"],
      kparams["out_wt"], kparams["out_b"])

    return out[:, :2].astype(jnp.float32).reshape(B, S, 2)


def pointer_forward(hp, sp, kparams, *, tm=512):
    """hp, sp: [B, S, H] float arrays. Returns logits [B, S, 2] float32."""
    try:
        return _pointer_forward_impl(hp, sp, kparams, tm=tm,
                                     single_buffer_weights=True)
    except Exception:
        # Fallback for JAX/Mosaic builds that reject pipeline_mode=pl.Buffered(1)
        # on the resident operands; identical math, just double-buffered weights.
        return _pointer_forward_impl(hp, sp, kparams, tm=tm,
                                     single_buffer_weights=False)


def pointer_reference(hp, sp, params):
    """Pure-JAX (fp32) reference of the PyTorch forward."""
    h = (sp * hp
         + sp @ params["us_w"].T + params["us_b"]
         + hp @ params["vh_w"].T + params["vh_b"])
    return h @ params["out_w"].T + params["out_b"]


def init_params(key, hidden):
    ks = jax.random.split(key, 6)
    scale = 1.0 / jnp.sqrt(hidden)
    return {
        "us_w": jax.random.uniform(ks[0], (hidden, hidden), jnp.float32, -scale, scale),
        "us_b": jax.random.uniform(ks[1], (hidden,), jnp.float32, -scale, scale),
        "vh_w": jax.random.uniform(ks[2], (hidden, hidden), jnp.float32, -scale, scale),
        "vh_b": jax.random.uniform(ks[3], (hidden,), jnp.float32, -scale, scale),
        "out_w": jax.random.uniform(ks[4], (2, hidden), jnp.float32, -scale, scale),
        "out_b": jax.random.uniform(ks[5], (2,), jnp.float32, -scale, scale),
    }


if __name__ == "__main__":
    B, S, H = 2, 8, 32
    key = jax.random.PRNGKey(0)
    k_hp, k_sp, k_param = jax.random.split(key, 3)

    hp = jax.random.normal(k_hp, (B, S, H), jnp.float32)
    sp = jax.random.normal(k_sp, (B, S, H), jnp.float32)
    params = init_params(k_param, H)
    kparams = prepare_pointer_params(params)

    out = pointer_forward(hp, sp, kparams)
    out = jax.block_until_ready(out)

    ref = pointer_reference(hp, sp, params)
    assert out.shape == (B, S, 2)
    # bf16 operands / bf16 output with f32 accumulation -> looser tolerance
    # than pure fp32.  NOTE (review): re-validate this tolerance at production
    # hidden sizes; rounding error grows with H and output magnitude.
    assert jnp.allclose(out, ref, atol=5e-2, rtol=5e-2), (
        f"max abs diff {float(jnp.max(jnp.abs(out - ref)))}")

    print("KERNEL_OK")
</pallas_src>

<mosaic_0001>
module attributes {stable_mosaic.version = 11 : i64} {
  func.func @pointer_kernel(%arg0: i32, %arg1: memref<16x32xbf16, #tpu.memory_space<vmem>>, %arg2: memref<16x32xbf16, #tpu.memory_space<vmem>>, %arg3: memref<32x32xbf16, #tpu.memory_space<vmem>>, %arg4: memref<32x32xbf16, #tpu.memory_space<vmem>>, %arg5: memref<1x32xf32, #tpu.memory_space<vmem>>, %arg6: memref<32x128xbf16, #tpu.memory_space<vmem>>, %arg7: memref<1x128xf32, #tpu.memory_space<vmem>>, %arg8: memref<16x128xbf16, #tpu.memory_space<vmem>>) attributes {dimension_semantics = [#tpu.dimension_semantics<parallel>], iteration_bounds = array<i64: 1>, scalar_prefetch = 0 : i64, scratch_operands = 0 : i64, tpu.core_type = #tpu.core_type<tc>, window_params = [{transform_indices = @transform_0, window_bounds = array<i64: 16, 32>}, {transform_indices = @transform_1, window_bounds = array<i64: 16, 32>}, {pipeline_mode = #tpu.pipeline_mode<synchronous>, transform_indices = @transform_2, window_bounds = array<i64: 32, 32>}, {pipeline_mode = #tpu.pipeline_mode<synchronous>, transform_indices = @transform_3, window_bounds = array<i64: 32, 32>}, {pipeline_mode = #tpu.pipeline_mode<synchronous>, transform_indices = @transform_4, window_bounds = array<i64: 1, 32>}, {pipeline_mode = #tpu.pipeline_mode<synchronous>, transform_indices = @transform_5, window_bounds = array<i64: 32, 128>}, {pipeline_mode = #tpu.pipeline_mode<synchronous>, transform_indices = @transform_6, window_bounds = array<i64: 1, 128>}, {transform_indices = @transform_7, window_bounds = array<i64: 16, 128>}]} {
    %c0 = arith.constant 0 : index
    %c0_0 = arith.constant 0 : index
    %0 = vector.load %arg1[%c0, %c0_0] : memref<16x32xbf16, #tpu.memory_space<vmem>>, vector<16x32xbf16>
    %c0_1 = arith.constant 0 : index
    %c0_2 = arith.constant 0 : index
    %1 = vector.load %arg2[%c0_1, %c0_2] : memref<16x32xbf16, #tpu.memory_space<vmem>>, vector<16x32xbf16>
    %c0_3 = arith.constant 0 : index
    %c0_4 = arith.constant 0 : index
    %2 = vector.load %arg3[%c0_3, %c0_4] : memref<32x32xbf16, #tpu.memory_space<vmem>>, vector<32x32xbf16>
    %cst = arith.constant dense<0.000000e+00> : vector<16x32xf32>
    %3 = tpu.matmul %1, %2, %cst {dimension_numbers = #tpu.dot_dimension_numbers<[1], [0], [0], [1], [0, 0, 1, 1], [], []>} : vector<16x32xbf16>, vector<32x32xbf16>, vector<16x32xf32> -> vector<16x32xf32>
    %c0_5 = arith.constant 0 : index
    %c0_6 = arith.constant 0 : index
    %4 = vector.load %arg4[%c0_5, %c0_6] : memref<32x32xbf16, #tpu.memory_space<vmem>>, vector<32x32xbf16>
    %cst_7 = arith.constant dense<0.000000e+00> : vector<16x32xf32>
    %5 = tpu.matmul %0, %4, %cst_7 {dimension_numbers = #tpu.dot_dimension_numbers<[1], [0], [0], [1], [0, 0, 1, 1], [], []>} : vector<16x32xbf16>, vector<32x32xbf16>, vector<16x32xf32> -> vector<16x32xf32>
    %6 = arith.addf %3, %5 : vector<16x32xf32>
    %7 = arith.extf %0 : vector<16x32xbf16> to vector<16x32xf32>
    %8 = arith.extf %1 : vector<16x32xbf16> to vector<16x32xf32>
    %9 = arith.mulf %7, %8 : vector<16x32xf32>
    %10 = arith.addf %6, %9 : vector<16x32xf32>
    %c0_8 = arith.constant 0 : index
    %c0_9 = arith.constant 0 : index
    %11 = vector.load %arg5[%c0_8, %c0_9] : memref<1x32xf32, #tpu.memory_space<vmem>>, vector<1x32xf32>
    %12 = vector.broadcast %11 : vector<1x32xf32> to vector<16x32xf32>
    %13 = arith.addf %10, %12 : vector<16x32xf32>
    %14 = arith.truncf %13 : vector<16x32xf32> to vector<16x32xbf16>
    %c0_10 = arith.constant 0 : index
    %c0_11 = arith.constant 0 : index
    %15 = vector.load %arg6[%c0_10, %c0_11] : memref<32x128xbf16, #tpu.memory_space<vmem>>, vector<32x128xbf16>
    %cst_12 = arith.constant dense<0.000000e+00> : vector<16x128xf32>
    %16 = tpu.matmul %14, %15, %cst_12 {dimension_numbers = #tpu.dot_dimension_numbers<[1], [0], [0], [1], [0, 0, 1, 1], [], []>} : vector<16x32xbf16>, vector<32x128xbf16>, vector<16x128xf32> -> vector<16x128xf32>
    %c0_13 = arith.constant 0 : index
    %c0_14 = arith.constant 0 : index
    %17 = vector.load %arg7[%c0_13, %c0_14] : memref<1x128xf32, #tpu.memory_space<vmem>>, vector<1x128xf32>
    %18 = vector.broadcast %17 : vector<1x128xf32> to vector<16x128xf32>
    %19 = arith.addf %16, %18 : vector<16x128xf32>
    %20 = arith.truncf %19 : vector<16x128xf32> to vector<16x128xbf16>
    %c0_15 = arith.constant 0 : index
    %c0_16 = arith.constant 0 : index
    %21 = vector.load %arg8[%c0_15, %c0_16] : memref<16x128xbf16, #tpu.memory_space<vmem>>, vector<16x128xbf16>
    tpu.vector_store %arg8[%c0_15, %c0_16], %20 {strides = array<i32>} : memref<16x128xbf16, #tpu.memory_space<vmem>>, vector<16x128xbf16>,
    return
  }
  func.func @transform_0(%arg0: i32) -> (i32, i32) {
    %c0_i32 = arith.constant 0 : i32
    %c0_i32_0 = arith.constant 0 : i32
    return %arg0, %c0_i32 : i32, i32
  }
  func.func @transform_1(%arg0: i32) -> (i32, i32) {
    %c0_i32 = arith.constant 0 : i32
    %c0_i32_0 = arith.constant 0 : i32
    return %arg0, %c0_i32 : i32, i32
  }
  func.func @transform_2(%arg0: i32) -> (i32, i32) {
    %c0_i32 = arith.constant 0 : i32
    %c0_i32_0 = arith.constant 0 : i32
    %c0_i32_1 = arith.constant 0 : i32
    return %c0_i32, %c0_i32_0 : i32, i32
  }
  func.func @transform_3(%arg0: i32) -> (i32, i32) {
    %c0_i32 = arith.constant 0 : i32
    %c0_i32_0 = arith.constant 0 : i32
    %c0_i32_1 = arith.constant 0 : i32
    return %c0_i32, %c0_i32_0 : i32, i32
  }
  func.func @transform_4(%arg0: i32) -> (i32, i32) {
    %c0_i32 = arith.constant 0 : i32
    %c0_i32_0 = arith.constant 0 : i32
    %c0_i32_1 = arith.constant 0 : i32
    return %c0_i32, %c0_i32_0 : i32, i32
  }
  func.func @transform_5(%arg0: i32) -> (i32, i32) {
    %c0_i32 = arith.constant 0 : i32
    %c0_i32_0 = arith.constant 0 : i32
    %c0_i32_1 = arith.constant 0 : i32
    return %c0_i32, %c0_i32_0 : i32, i32
  }
  func.func @transform_6(%arg0: i32) -> (i32, i32) {
    %c0_i32 = arith.constant 0 : i32
    %c0_i32_0 = arith.constant 0 : i32
    %c0_i32_1 = arith.constant 0 : i32
    return %c0_i32, %c0_i32_0 : i32, i32
  }
  func.func @transform_7(%arg0: i32) -> (i32, i32) {
    %c0_i32 = arith.constant 0 : i32
    %c0_i32_0 = arith.constant 0 : i32
    return %arg0, %c0_i32 : i32, i32
  }
}

module attributes {stable_mosaic.version = 11 : i64} {
  func.func @pointer_kernel(%arg0: i32, %arg1: memref<16x32xbf16, #tpu.memory_space<vmem>>, %arg2: memref<16x32xbf16, #tpu.memory_space<vmem>>, %arg3: memref<32x32xbf16, #tpu.memory_space<vmem>>, %arg4: memref<32x32xbf16, #tpu.memory_space<vmem>>, %arg5: memref<1x32xf32, #tpu.memory_space<vmem>>, %arg6: memref<32x128xbf16, #tpu.memory_space<vmem>>, %arg7: memref<1x128xf32, #tpu.memory_space<vmem>>, %arg8: memref<16x128xbf16, #tpu.memory_space<vmem>>) attributes {dimension_semantics = [#tpu.dimension_semantics<parallel>], iteration_bounds = array<i64: 1>, scalar_prefetch = 0 : i64, scratch_operands = 0 : i64, tpu.core_type = #tpu.core_type<tc>, window_params = [{transform_indices = @transform_0, window_bounds = array<i64: 16, 32>}, {transform_indices = @transform_1, window_bounds = array<i64: 16, 32>}, {pipeline_mode = #tpu.pipeline_mode<synchronous>, transform_indices = @transform_2, window_bounds = array<i64: 32, 32>}, {pipeline_mode = #tpu.pipeline_mode<synchronous>, transform_indices = @transform_3, window_bounds = array<i64: 32, 32>}, {pipeline_mode = #tpu.pipeline_mode<synchronous>, transform_indices = @transform_4, window_bounds = array<i64: 1, 32>}, {pipeline_mode = #tpu.pipeline_mode<synchronous>, transform_indices = @transform_5, window_bounds = array<i64: 32, 128>}, {pipeline_mode = #tpu.pipeline_mode<synchronous>, transform_indices = @transform_6, window_bounds = array<i64: 1, 128>}, {transform_indices = @transform_7, window_bounds = array<i64: 16, 128>}]} {
    %c0 = arith.constant 0 : index
    %c0_0 = arith.constant 0 : index
    %0 = vector.load %arg1[%c0, %c0_0] : memref<16x32xbf16, #tpu.memory_space<vmem>>, vector<16x32xbf16>
    %c0_1 = arith.constant 0 : index
    %c0_2 = arith.constant 0 : index
    %1 = vector.load %arg2[%c0_1, %c0_2] : memref<16x32xbf16, #tpu.memory_space<vmem>>, vector<16x32xbf16>
    %c0_3 = arith.constant 0 : index
    %c0_4 = arith.constant 0 : index
    %2 = vector.load %arg3[%c0_3, %c0_4] : memref<32x32xbf16, #tpu.memory_space<vmem>>, vector<32x32xbf16>
    %cst = arith.constant dense<0.000000e+00> : vector<16x32xf32>
    %3 = tpu.matmul %1, %2, %cst {dimension_numbers = #tpu.dot_dimension_numbers<[1], [0], [0], [1], [0, 0, 1, 1], [], []>} : vector<16x32xbf16>, vector<32x32xbf16>, vector<16x32xf32> -> vector<16x32xf32>
    %c0_5 = arith.constant 0 : index
    %c0_6 = arith.constant 0 : index
    %4 = vector.load %arg4[%c0_5, %c0_6] : memref<32x32xbf16, #tpu.memory_space<vmem>>, vector<32x32xbf16>
    %cst_7 = arith.constant dense<0.000000e+00> : vector<16x32xf32>
    %5 = tpu.matmul %0, %4, %cst_7 {dimension_numbers = #tpu.dot_dimension_numbers<[1], [0], [0], [1], [0, 0, 1, 1], [], []>} : vector<16x32xbf16>, vector<32x32xbf16>, vector<16x32xf32> -> vector<16x32xf32>
    %6 = arith.addf %3, %5 : vector<16x32xf32>
    %7 = arith.extf %0 : vector<16x32xbf16> to vector<16x32xf32>
    %8 = arith.extf %1 : vector<16x32xbf16> to vector<16x32xf32>
    %9 = arith.mulf %7, %8 : vector<16x32xf32>
    %10 = arith.addf %6, %9 : vector<16x32xf32>
    %c0_8 = arith.constant 0 : index
    %c0_9 = arith.constant 0 : index
    %11 = vector.load %arg5[%c0_8, %c0_9] : memref<1x32xf32, #tpu.memory_space<vmem>>, vector<1x32xf32>
    %12 = vector.broadcast %11 : vector<1x32xf32> to vector<16x32xf32>
    %13 = arith.addf %10, %12 : vector<16x32xf32>
    %14 = arith.truncf %13 : vector<16x32xf32> to vector<16x32xbf16>
    %c0_10 = arith.constant 0 : index
    %c0_11 = arith.constant 0 : index
    %15 = vector.load %arg6[%c0_10, %c0_11] : memref<32x128xbf16, #tpu.memory_space<vmem>>, vector<32x128xbf16>
    %cst_12 = arith.constant dense<0.000000e+00> : vector<16x128xf32>
    %16 = tpu.matmul %14, %15, %cst_12 {dimension_numbers = #tpu.dot_dimension_numbers<[1], [0], [0], [1], [0, 0, 1, 1], [], []>} : vector<16x32xbf16>, vector<32x128xbf16>, vector<16x128xf32> -> vector<16x128xf32>
    %c0_13 = arith.constant 0 : index
    %c0_14 = arith.constant 0 : index
    %17 = vector.load %arg7[%c0_13, %c0_14] : memref<1x128xf32, #tpu.memory_space<vmem>>, vector<1x128xf32>
    %18 = vector.broadcast %17 : vector<1x128xf32> to vector<16x128xf32>
    %19 = arith.addf %16, %18 : vector<16x128xf32>
    %20 = arith.truncf %19 : vector<16x128xf32> to vector<16x128xbf16>
    %c0_15 = arith.constant 0 : index
    %c0_16 = arith.constant 0 : index
    %21 = vector.load %arg8[%c0_15, %c0_16] : memref<16x128xbf16, #tpu.memory_space<vmem>>, vector<16x128xbf16>
    tpu.vector_store %arg8[%c0_15, %c0_16], %20 {strides = array<i32>} : memref<16x128xbf16, #tpu.memory_space<vmem>>, vector<16x128xbf16>,
    return
  }
  func.func @transform_0(%arg0: i32) -> (i32, i32) {
    %c0_i32 = arith.constant 0 : i32
    %c0_i32_0 = arith.constant 0 : i32
    return %arg0, %c0_i32 : i32, i32
  }
  func.func @transform_1(%arg0: i32) -> (i32, i32) {
    %c0_i32 = arith.constant 0 : i32
    %c0_i32_0 = arith.constant 0 : i32
    return %arg0, %c0_i32 : i32, i32
  }
  func.func @transform_2(%arg0: i32) -> (i32, i32) {
    %c0_i32 = arith.constant 0 : i32
    %c0_i32_0 = arith.constant 0 : i32
    %c0_i32_1 = arith.constant 0 : i32
    return %c0_i32, %c0_i32_0 : i32, i32
  }
  func.func @transform_3(%arg0: i32) -> (i32, i32) {
    %c0_i32 = arith.constant 0 : i32
    %c0_i32_0 = arith.constant 0 : i32
    %c0_i32_1 = arith.constant 0 : i32
    return %c0_i32, %c0_i32_0 : i32, i32
  }
  func.func @transform_4(%arg0: i32) -> (i32, i32) {
    %c0_i32 = arith.constant 0 : i32
    %c0_i32_0 = arith.constant 0 : i32
    %c0_i32_1 = arith.constant 0 : i32
    return %c0_i32, %c0_i32_0 : i32, i32
  }
  func.func @transform_5(%arg0: i32) -> (i32, i32) {
    %c0_i32 = arith.constant 0 : i32
    %c0_i32_0 = arith.constant 0 : i32
    %c0_i32_1 = arith.constant 0 : i32
    return %c0_i32, %c0_i32_0 : i32, i32
  }
  func.func @transform_6(%arg0: i32) -> (i32, i32) {
    %c0_i32 = arith.constant 0 : i32
    %c0_i32_0 = arith.constant 0 : i32
    %c0_i32_1 = arith.constant 0 : i32
    return %c0_i32, %c0_i32_0 : i32, i32
  }
  func.func @transform_7(%arg0: i32) -> (i32, i32) {
    %c0_i32 = arith.constant 0 : i32
    %c0_i32_0 = arith.constant 0 : i32
    return %arg0, %c0_i32 : i32, i32
  }
}

</mosaic_0001>

<bundles_post_ra>
// kernel: _pointer_forward_impl.1
= control target key start
LH: loop header
LB: loop body
LE: loop exit
PB: predicated region body
PF: predicated region fallthrough
CT: control target
= control target key end

     0   :  { %v328_v0 = vmov 0.0   ;;  %vm329_vm0 = vmmov 0   ;;  %vm56_vm1 = vcmask 261120   ;;  %s409_s3 = inlined_call_operand.vmem [shape: bf16[32,32], index: 3, kind: input, shape index: {}]   ;;  %s410_s2 = inlined_call_operand.vmem [shape: bf16[32,32], index: 2, kind: input, shape index: {}]   ;;  %s411_s0 = inlined_call_operand.vmem [shape: bf16[16,32], index: 0, kind: input, shape index: {}]   ;;  %s412_s1 = inlined_call_operand.vmem [shape: bf16[16,32], index: 1, kind: input, shape index: {}]   ;;  %s413_s5 = inlined_call_operand.vmem [shape: bf16[32,128], index: 5, kind: input, shape index: {}]   ;;  %s414_s4 = inlined_call_operand.vmem [shape: f32[1,32], index: 4, kind: input, shape index: {}]   ;;  %s415_s6 = inlined_call_operand.vmem [shape: f32[1,128], index: 6, kind: input, shape index: {}]   ;;  %s416_s7 = inlined_call_operand.vmem [shape: bf16[16,128], index: 7, kind: output, shape index: {}]  }
   0x1   :  { %292 = vmatprep.subr.bf16.mxu0 %v328_v0  ;;  %300 = vmatprep.subr.bf16.mxu1 %v328_v0  ;;  %v318_v1 = vld [vmem:[%s409_s3] sm:$0xff]   ;;  %v320_v3 = vld [vmem:[%s409_s3 + $0x8] sm:$0xff]  }
   0x2   :  { %v319_v2 = vld [vmem:[%s410_s2] sm:$0xff]   ;;  %296 = vmatprep.mubr.msk.bf16.mxu0 %vm329_vm0, %v328_v0  ;;  %304 = vmatprep.mubr.msk.bf16.mxu1 %vm329_vm0, %v328_v0  ;;  %v321_v4 = vld [vmem:[%s410_s2 + $0x8] sm:$0xff]  }
   0x3   :  { %293 = vmatpush3.bf16.msra.mxu0 %v318_v1  ;;  %301 = vmatpush3.bf16.msra.mxu1 %v319_v2  ;;  %v27_v5 = vld [vmem:[%s411_s0] sm:$0xff]   ;;  %v325_v8 = vld [vmem:[%s413_s5 + $0x8] sm:$0xff]  }
   0x4   :  { %294 = vmatprep.subr.bf16.mxu0 %v328_v0  ;;  %302 = vmatprep.subr.bf16.mxu1 %v328_v0  ;;  %v29_v6 = vld [vmem:[%s412_s1] sm:$0xff]   ;;  %v162_v9 = vunpack.c.l.bf16 %v27_v5  ;;  %v163_v11 = vunpack.c.h.bf16 %v27_v5 }
   0x5   :  { %v324_v7 = vld [vmem:[%s413_s5] sm:$0xff]   ;;  %v164_v10 = vunpack.c.l.bf16 %v29_v6  ;;  %v165_v12 = vunpack.c.h.bf16 %v29_v6 }
   0x6   :  { %v269_v26 = vld [vmem:[%s414_s4] ss:$0 sm:$0xff] }
   0x7   :  { %295 = vmatpush3.bf16.msra.mxu0 %v320_v3  ;;  %303 = vmatpush3.bf16.msra.mxu1 %v321_v4  ;;  %v166_v14 = vmul.f32 %v164_v10, %v162_v9  ;;  %v167_v20 = vmul.f32 %v165_v12, %v163_v11  ;;  %v270_v31 = vld [vmem:[%s415_s6] ss:$0 sm:$0xff] }
   0x8   :  { %308 = vmatprep.subr.bf16.mxu0 %v328_v0 }
   0xa   :  { %297 = vmatmul.mubr.msk.bf16.vlgmr.msra.gmra.mrb[0].mxu0 %vm56_vm1, %v27_v5  ;;  %305 = vmatmul.mubr.msk.bf16.vlgmr.msra.gmra.mrb[0].mxu1 %vm56_vm1, %v29_v6 }
   0xb   :  { %312 = vmatprep.mubr.msk.bf16.mxu0 %vm329_vm0, %v328_v0  ;;  %309 = vmatpush3.bf16.msra.mxu0 %v324_v7 }
   0xc   :  { %310 = vmatprep.subr.bf16.mxu0 %v328_v0 }
   0xf   :  { %311 = vmatpush3.bf16.msra.mxu0 %v325_v8 }
  0xdd   :  { %v94_v13 = vpop.f32.mrb[0].mxu0  ;;  %v155_v15 = vpop.f32.mrb[0].mxu1 }
  0xde   :  { %v298_v16 = vpop.f32.mrb[1].mxu0  ;;  %v156_v17 = vadd.f32 %v155_v15, %v94_v13  ;;  %v306_v18 = vpop.f32.mrb[1].mxu1 }
  0xdf   :  { %v97_v19 = vpop.f32.mrb[2].mxu0  ;;  %v158_v21 = vpop.f32.mrb[2].mxu1 }
  0xe0   :  { %v299_v22 = vpop.f32.mrb[3].mxu0  ;;  %v168_v23 = vadd.f32 %v166_v14, %v156_v17  ;;  %v159_v24 = vadd.f32 %v158_v21, %v97_v19  ;;  %v307_v25 = vpop.f32.mrb[3].mxu1 }
  0xe2   :  { %v169_v27 = vadd.f32 %v167_v20, %v159_v24  ;;  %v177_v28 = vadd.f32 %v269_v26, %v168_v23 }
  0xe4   :  { %v178_v29 = vadd.f32 %v269_v26, %v169_v27 }
  0xe6   :  { %v179_v30 = vpack.c.bf16 %v178_v29, %v177_v28 }
  0xe8   :  { %313 = vmatmul.mubr.msk.bf16.vlgmr.msra.gmra.mrb[4].mxu0 %vm56_vm1, %v179_v30 }
 0x1bb   :  { %v240_v32 = vpop.f32.mrb[4].mxu0 }
 0x1bc   :  { %v314_v33 = vpop.f32.mrb[5].mxu0  ;;  %v241_v35 = vadd.f32 %v270_v31, %v240_v32 }
 0x1bd   :  { %v243_v34 = vpop.f32.mrb[6].mxu0 }
 0x1be   :  { %v244_v36 = vadd.f32 %v270_v31, %v243_v34  ;;  %v315_v37 = vpop.f32.mrb[7].mxu0 }
 0x1c0   :  { %v281_v38 = vpack.c.bf16 %v244_v36, %v241_v35 }
 0x1c2   :  { %282 = vst [vmem:[%s416_s7] sm:$0xff] %v281_v38  }

// kernel: _pointer_forward_impl.1
= control target key start
LH: loop header
LB: loop body
LE: loop exit
PB: predicated region body
PF: predicated region fallthrough
CT: control target
= control target key end

     0   :  { %v328_v0 = vmov 0.0   ;;  %vm329_vm0 = vmmov 0   ;;  %vm56_vm1 = vcmask 261120   ;;  %s409_s3 = inlined_call_operand.vmem [shape: bf16[32,32], index: 3, kind: input, shape index: {}]   ;;  %s410_s2 = inlined_call_operand.vmem [shape: bf16[32,32], index: 2, kind: input, shape index: {}]   ;;  %s411_s0 = inlined_call_operand.vmem [shape: bf16[16,32], index: 0, kind: input, shape index: {}]   ;;  %s412_s1 = inlined_call_operand.vmem [shape: bf16[16,32], index: 1, kind: input, shape index: {}]   ;;  %s413_s5 = inlined_call_operand.vmem [shape: bf16[32,128], index: 5, kind: input, shape index: {}]   ;;  %s414_s4 = inlined_call_operand.vmem [shape: f32[1,32], index: 4, kind: input, shape index: {}]   ;;  %s415_s6 = inlined_call_operand.vmem [shape: f32[1,128], index: 6, kind: input, shape index: {}]   ;;  %s416_s7 = inlined_call_operand.vmem [shape: bf16[16,128], index: 7, kind: output, shape index: {}]  }
   0x1   :  { %292 = vmatprep.subr.bf16.mxu0 %v328_v0  ;;  %300 = vmatprep.subr.bf16.mxu1 %v328_v0  ;;  %v318_v1 = vld [vmem:[%s409_s3] sm:$0xff]   ;;  %v320_v3 = vld [vmem:[%s409_s3 + $0x8] sm:$0xff]  }
   0x2   :  { %v319_v2 = vld [vmem:[%s410_s2] sm:$0xff]   ;;  %296 = vmatprep.mubr.msk.bf16.mxu0 %vm329_vm0, %v328_v0  ;;  %304 = vmatprep.mubr.msk.bf16.mxu1 %vm329_vm0, %v328_v0  ;;  %v321_v4 = vld [vmem:[%s410_s2 + $0x8] sm:$0xff]  }
   0x3   :  { %293 = vmatpush3.bf16.msra.mxu0 %v318_v1  ;;  %301 = vmatpush3.bf16.msra.mxu1 %v319_v2  ;;  %v27_v5 = vld [vmem:[%s411_s0] sm:$0xff]   ;;  %v325_v8 = vld [vmem:[%s413_s5 + $0x8] sm:$0xff]  }
   0x4   :  { %294 = vmatprep.subr.bf16.mxu0 %v328_v0  ;;  %302 = vmatprep.subr.bf16.mxu1 %v328_v0  ;;  %v29_v6 = vld [vmem:[%s412_s1] sm:$0xff]   ;;  %v162_v9 = vunpack.c.l.bf16 %v27_v5  ;;  %v163_v11 = vunpack.c.h.bf16 %v27_v5 }
   0x5   :  { %v324_v7 = vld [vmem:[%s413_s5] sm:$0xff]   ;;  %v164_v10 = vunpack.c.l.bf16 %v29_v6  ;;  %v165_v12 = vunpack.c.h.bf16 %v29_v6 }
   0x6   :  { %v269_v26 = vld [vmem:[%s414_s4] ss:$0 sm:$0xff] }
   0x7   :  { %295 = vmatpush3.bf16.msra.mxu0 %v320_v3  ;;  %303 = vmatpush3.bf16.msra.mxu1 %v321_v4  ;;  %v166_v14 = vmul.f32 %v164_v10, %v162_v9  ;;  %v167_v20 = vmul.f32 %v165_v12, %v163_v11  ;;  %v270_v31 = vld [vmem:[%s415_s6] ss:$0 sm:$0xff] }
   0x8   :  { %308 = vmatprep.subr.bf16.mxu0 %v328_v0 }
   0xa   :  { %297 = vmatmul.mubr.msk.bf16.vlgmr.msra.gmra.mrb[0].mxu0 %vm56_vm1, %v27_v5  ;;  %305 = vmatmul.mubr.msk.bf16.vlgmr.msra.gmra.mrb[0].mxu1 %vm56_vm1, %v29_v6 }
   0xb   :  { %312 = vmatprep.mubr.msk.bf16.mxu0 %vm329_vm0, %v328_v0  ;;  %309 = vmatpush3.bf16.msra.mxu0 %v324_v7 }
   0xc   :  { %310 = vmatprep.subr.bf16.mxu0 %v328_v0 }
   0xf   :  { %311 = vmatpush3.bf16.msra.mxu0 %v325_v8 }
  0xdd   :  { %v94_v13 = vpop.f32.mrb[0].mxu0  ;;  %v155_v15 = vpop.f32.mrb[0].mxu1 }
  0xde   :  { %v298_v16 = vpop.f32.mrb[1].mxu0  ;;  %v156_v17 = vadd.f32 %v155_v15, %v94_v13  ;;  %v306_v18 = vpop.f32.mrb[1].mxu1 }
  0xdf   :  { %v97_v19 = vpop.f32.mrb[2].mxu0  ;;  %v158_v21 = vpop.f32.mrb[2].mxu1 }
  0xe0   :  { %v299_v22 = vpop.f32.mrb[3].mxu0  ;;  %v168_v23 = vadd.f32 %v166_v14, %v156_v17  ;;  %v159_v24 = vadd.f32 %v158_v21, %v97_v19  ;;  %v307_v25 = vpop.f32.mrb[3].mxu1 }
  0xe2   :  { %v169_v27 = vadd.f32 %v167_v20, %v159_v24  ;;  %v177_v28 = vadd.f32 %v269_v26, %v168_v23 }
  0xe4   :  { %v178_v29 = vadd.f32 %v269_v26, %v169_v27 }
  0xe6   :  { %v179_v30 = vpack.c.bf16 %v178_v29, %v177_v28 }
  0xe8   :  { %313 = vmatmul.mubr.msk.bf16.vlgmr.msra.gmra.mrb[4].mxu0 %vm56_vm1, %v179_v30 }
 0x1bb   :  { %v240_v32 = vpop.f32.mrb[4].mxu0 }
 0x1bc   :  { %v314_v33 = vpop.f32.mrb[5].mxu0  ;;  %v241_v35 = vadd.f32 %v270_v31, %v240_v32 }
 0x1bd   :  { %v243_v34 = vpop.f32.mrb[6].mxu0 }
 0x1be   :  { %v244_v36 = vadd.f32 %v270_v31, %v243_v34  ;;  %v315_v37 = vpop.f32.mrb[7].mxu0 }
 0x1c0   :  { %v281_v38 = vpack.c.bf16 %v244_v36, %v241_v35 }
 0x1c2   :  { %282 = vst [vmem:[%s416_s7] sm:$0xff] %v281_v38  }

</bundles_post_ra>
